<compile_context>
chip_gen: v6e
topology: v6e:2x2x1
jax: 0.10.0
libtpu: 0.0.40
codegen_flags: <defaults>
</compile_context>

<pallas_src>
import jax
import jax.numpy as jnp
from jax.experimental import pallas as pl
from jax.experimental.pallas import tpu as pltpu


def _square_kernel(x_ref, o_ref):
    v = x_ref[...]
    o_ref[...] = v * v


def _device_kind():
    try:
        return jax.devices()[0].device_kind.lower()
    except Exception:
        return ""


def _sublane_pack(itemsize):
    # Rows per fully-packed sublane tile: f32 -> 8, bf16/f16 -> 16, int8/fp8 -> 32.
    return max(8, 8 * (4 // max(1, itemsize)))


def _pallas_square_2d(x2d, block_rows, lane, semantics):
    rows = x2d.shape[0]
    return pl.pallas_call(
        _square_kernel,
        out_shape=jax.ShapeDtypeStruct((rows, lane), x2d.dtype),
        grid_spec=pltpu.PrefetchScalarGridSpec(
            num_scalar_prefetch=0,
            grid=(pl.cdiv(rows, block_rows),),
            in_specs=[pl.BlockSpec((block_rows, lane), lambda i: (i, 0))],
            out_specs=pl.BlockSpec((block_rows, lane), lambda i: (i, 0)),
        ),
        compiler_params=pltpu.CompilerParams(
            dimension_semantics=semantics,
            vmem_limit_bytes=32 * 1024 * 1024,
        ),
    )(x2d)


def net_static_forward(x, *, min_pallas_elems=1 << 20):
    """Elementwise square of x (same shape/dtype as input).

    Tensors below `min_pallas_elems` (or with a ragged element count) use
    plain x*x: fused XLA is at least as fast as a custom call there, needs no
    padded copy / tail slice, and keeps fusion with neighbors.
    """
    n = x.size
    if n == 0 or n < min_pallas_elems or n % 128 != 0:
        return x * x

    # Widest lane-dense 2D view whose last dim (multiple of 128) divides n.
    lane = 128
    for cand in (8192, 4096, 2048, 1024, 512, 256):
        if n % cand == 0:
            lane = cand
            break
    rows = n // lane
    x2d = x.reshape(rows, lane)  # metadata-only for the default row-major layout

    itemsize = jnp.dtype(x.dtype).itemsize
    sublane = _sublane_pack(itemsize)

    kind = _device_kind()
    is_v7 = "v7" in kind
    n_cores = 2 if is_v7 else 1  # v7x has 2 TensorCores per chip

    if rows <= sublane:
        # Single full-extent block (legal: block dims == full array dims).
        block_rows = rows
    else:
        # (a) tile budget: <= ~4 MiB per buffer; in+out double-buffered stays
        #     ~16 MiB, under the 32 MiB scoped limit on every generation.
        budget_rows = max(sublane,
                          (4 << 20) // (lane * itemsize) // sublane * sublane)
        # (b) pipeline depth: aim for >= 8 grid steps per core so the BlockSpec
        #     software pipeline hides the prologue load and epilogue writeback.
        target_steps = 8 * n_cores
        steps_rows = -(-rows // target_steps)                      # ceil
        steps_rows = max(sublane, -(-steps_rows // sublane) * sublane)
        block_rows = max(sublane, min(budget_rows, steps_rows, rows))

    grid_steps = pl.cdiv(rows, block_rows)

    # v7x: shard the row axis explicitly across both TensorCores.  On v5e/v6e
    # "parallel" vs "arbitrary" does not change codegen, so keep the portable
    # string there.
    semantics = (pltpu.CORE_PARALLEL,) if (is_v7 and grid_steps >= 2) else ("parallel",)

    try:
        out2d = _pallas_square_2d(x2d, block_rows, lane, semantics)
    except Exception:
        if semantics == ("parallel",):
            raise
        # Defensive fallback if CORE_PARALLEL is rejected for this grid.
        out2d = _pallas_square_2d(x2d, block_rows, lane, ("parallel",))

    return out2d.reshape(x.shape)


if __name__ == "__main__":
    key = jax.random.PRNGKey(0)
    k1, k2, k3 = jax.random.split(key, 3)

    # Small NCHW input consistent with the module's forward.  Under the default
    # threshold this stays on the fused XLA x*x path (as intended).
    x = jax.random.normal(k1, (2, 4, 16, 16), dtype=jnp.float32)
    out = net_static_forward(x)
    jax.block_until_ready(out)
    assert out.shape == x.shape and out.dtype == x.dtype
    assert jnp.allclose(out, x * x)

    # Same small input, forcing the Pallas path (single full-extent block).
    out_p = net_static_forward(x, min_pallas_elems=0)
    jax.block_until_ready(out_p)
    assert out_p.shape == x.shape and out_p.dtype == x.dtype
    assert jnp.allclose(out_p, x * x)

    # Large f32 input: multi-step tiled streaming path (>= 8 grid steps).
    xb = jax.random.normal(k2, (8, 32, 128, 128), dtype=jnp.float32)
    outb = net_static_forward(xb)
    jax.block_until_ready(outb)
    assert outb.shape == xb.shape and outb.dtype == xb.dtype
    assert jnp.allclose(outb, xb * xb)

    # Large bf16 input: exercises the 16-row sublane-packing path.
    xc = jax.random.normal(k3, (4, 16, 128, 256), dtype=jnp.bfloat16)
    outc = net_static_forward(xc)
    jax.block_until_ready(outc)
    assert outc.shape == xc.shape and outc.dtype == xc.dtype
    assert jnp.allclose(outc.astype(jnp.float32), (xc * xc).astype(jnp.float32))

    # Ragged element count: stays on the fused XLA fallback.
    xr = jax.random.normal(k1, (3, 5, 7), dtype=jnp.float32)
    outr = net_static_forward(xr)
    jax.block_until_ready(outr)
    assert jnp.allclose(outr, xr * xr)

    print("KERNEL_OK")
</pallas_src>

<mosaic_0001>
module attributes {stable_mosaic.version = 11 : i64} {
  func.func @_square_kernel(%arg0: i32, %arg1: memref<1x2048xf32, #tpu.memory_space<vmem>>, %arg2: memref<1x2048xf32, #tpu.memory_space<vmem>>) attributes {dimension_semantics = [#tpu.dimension_semantics<parallel>], iteration_bounds = array<i64: 1>, scalar_prefetch = 0 : i64, scratch_operands = 0 : i64, tpu.core_type = #tpu.core_type<tc>, window_params = [{transform_indices = @transform_0, window_bounds = array<i64: 1, 2048>}, {transform_indices = @transform_1, window_bounds = array<i64: 1, 2048>}]} {
    %c0 = arith.constant 0 : index
    %c0_0 = arith.constant 0 : index
    %0 = vector.load %arg1[%c0, %c0_0] : memref<1x2048xf32, #tpu.memory_space<vmem>>, vector<1x2048xf32>
    %1 = arith.mulf %0, %0 : vector<1x2048xf32>
    %c0_1 = arith.constant 0 : index
    %c0_2 = arith.constant 0 : index
    %2 = vector.load %arg2[%c0_1, %c0_2] : memref<1x2048xf32, #tpu.memory_space<vmem>>, vector<1x2048xf32>
    tpu.vector_store %arg2[%c0_1, %c0_2], %1 {strides = array<i32>} : memref<1x2048xf32, #tpu.memory_space<vmem>>, vector<1x2048xf32>,
    return
  }
  func.func @transform_0(%arg0: i32) -> (i32, i32) {
    %c0_i32 = arith.constant 0 : i32
    %c0_i32_0 = arith.constant 0 : i32
    return %arg0, %c0_i32 : i32, i32
  }
  func.func @transform_1(%arg0: i32) -> (i32, i32) {
    %c0_i32 = arith.constant 0 : i32
    %c0_i32_0 = arith.constant 0 : i32
    return %arg0, %c0_i32 : i32, i32
  }
}

</mosaic_0001>

<bundles_post_ra>
// kernel: tpu_custom_call.1
= control target key start
LH: loop header
LB: loop body
LE: loop exit
PB: predicated region body
PF: predicated region fallthrough
CT: control target
= control target key end

     0   :  { %6 = vsyncpa [#allocation3], 0  ;;  %s106_s0 = inlined_call_operand.hbm [shape: f32[1,2048], index: 0, kind: input, shape index: {}]   ;;  %s107_s1 = inlined_call_operand.hbm [shape: f32[1,2048], index: 1, kind: output, shape index: {}]  }
   0x1   :  { %7 = vsyncpa [#allocation4], 0  ;;  %s88_s6 = smov [#allocation2]  }
   0x2   :  { %s14_s7 = sshll.u32 %s88_s6, 4  ;;  %s15_s7 = int_to_ptr.vmem [resolvable:$true] %s14_s7 }
   0x3   :  { %s52_s8 = scalar_lea.vmem %s15_s7, 256  ;;  %p57_p1 = scmp.lt.s32.totalorder %s15_s7, %s15_s7 }
   0x4   :  { %p53_p0 = scmp.ne.s32.totalorder %s15_s7, %s52_s8  ;;  %p58_p2 = scmp.lt.s32.totalorder %s52_s8, %s52_s8 }
   0x6   :  { %p59_p3 = por %p58_p2, %p57_p1 }
   0x8   :  { %p60_p4 = pnand %p59_p3, %p53_p0 }
   0xa   :  { %63 = shalt.err (!%p60_p4)
}
   0xb   :  { %17 = dma.hbm_to_vmem [thread:$0]  %s106_s0, 256, %s15_s7, [#allocation3]  }
   0xc   :  { %84 = dma.done.wait [#allocation3], 256  }
   0xd   :  { %85 = vsyncadd [#allocation3], 4294967040  ;;  %s89_s11 = smov [#allocation5]   ;;  %v21_v0 = vld [vmem:[#allocation2] sm:$0xff]  ;;  %v22_v1 = vld [vmem:[#allocation2 + $0x8] sm:$0xff] }
   0xe   :  { %s33_s12 = sshll.u32 %s89_s11, 4  ;;  %v23_v2 = vmul.f32 %v21_v0, %v21_v0  ;;  %v24_v3 = vmul.f32 %v22_v1, %v22_v1  ;;  %s34_s12 = int_to_ptr.vmem [resolvable:$true] %s33_s12 }
   0xf   :  { %s64_s13 = scalar_lea.vmem %s34_s12, 256  ;;  %p69_p6 = scmp.lt.s32.totalorder %s34_s12, %s34_s12 }
  0x10   :  { %25 = vst [vmem:[#allocation5] sm:$0xff] %v23_v2  ;;  %26 = vst [vmem:[#allocation5 + $0x8] sm:$0xff] %v24_v3  ;;  %p65_p5 = scmp.ne.s32.totalorder %s34_s12, %s64_s13  ;;  %p70_p7 = scmp.lt.s32.totalorder %s64_s13, %s64_s13 }
  0x12   :  { %p71_p8 = por %p70_p7, %p69_p6 }
  0x14   :  { %p72_p9 = pnand %p71_p8, %p65_p5 }
  0x16   :  { %75 = shalt.err (!%p72_p9)
}
  0x17   :  { %36 = dma.vmem_to_hbm [thread:$0]  %s34_s12, 256, %s107_s1, [#allocation4]  }
  0x18   :  { %86 = dma.done.wait [#allocation4], 256  }
  0x19   :  { %87 = vsyncadd [#allocation4], 4294967040 }
  0x1a   :  { %40 = vsyncpa [#allocation3], 1 }
  0x1b   :  { %41 = vsyncpa [#allocation4], 1 }

</bundles_post_ra>
